<compile_context>
chip_gen: v6e
topology: v6e:2x2x1
jax: 0.10.0
libtpu: 0.0.40
codegen_flags: <defaults>
</compile_context>

<pallas_src>
import functools

import jax
import jax.numpy as jnp
from jax.experimental import pallas as pl
from jax.experimental.pallas import tpu as pltpu


def _obs_cost_kernel(state_ref, inp_ref, sum_ref, cnt_ref, *,
                     rows, tile_rows, steps_per_slice):
    i = pl.program_id(0)          # slice of the row range ("parallel" / megacore)
    j = pl.program_id(1)          # streaming step within the slice ("arbitrary")

    @pl.when(j == 0)
    def _():
        sum_ref[...] = jnp.zeros_like(sum_ref)
        cnt_ref[...] = jnp.zeros_like(cnt_ref)

    s = state_ref[...].astype(jnp.float32)
    x = inp_ref[...].astype(jnp.float32)

    # Row-validity mask based on the *unclamped* global block index: blocks past
    # the end of the array are re-reads of the last block (clamped index_map)
    # or partial-block garbage and must contribute nothing.
    gb = i * steps_per_slice + j
    row0 = gb * tile_rows
    local_row = jax.lax.broadcasted_iota(jnp.int32, (tile_rows, 128), 0)
    valid = (row0 + local_row) < rows

    mask = jnp.logical_and(jnp.isfinite(x), valid)   # msk = input.isfinite()
    diff = jnp.where(mask, s - x, 0.0)               # off-mask lanes contribute 0
    d2 = diff * diff
    c = mask.astype(jnp.float32)

    # Fold the (tile_rows,128) tile onto the (8,128) vector accumulators
    # (pure VPU adds); the final scalar reduction happens in the wrapper.
    sum_ref[...] += d2.reshape(tile_rows // 8, 8, 128).sum(axis=0)
    cnt_ref[...] += c.reshape(tile_rows // 8, 8, 128).sum(axis=0)


def base_obs_cost(state, inp, w=1.0, tile_rows=2048, num_slices=2):
    """w * mean((state - inp)^2) over elements where inp is finite."""
    assert state.shape == inp.shape
    lanes = 128
    total = int(state.size)
    rows = pl.cdiv(total, lanes)

    s_flat = state.reshape(-1)
    x_flat = inp.reshape(-1)
    if total % lanes != 0:
        # Rare ragged-lane case: pad only up to the next full lane row; the +inf
        # padding is rejected by the finiteness mask.
        pad = rows * lanes - total
        s_flat = jnp.pad(s_flat, (0, pad))
        x_flat = jnp.pad(x_flat, (0, pad), constant_values=jnp.inf)
    s2 = s_flat.reshape(rows, lanes)
    x2 = x_flat.reshape(rows, lanes)

    # Clamp the tile to the (8-rounded) problem size; keep a multiple of 8 rows.
    tile_rows = max(8, min(int(tile_rows), ((rows + 7) // 8) * 8))
    blocks = pl.cdiv(rows, tile_rows)
    num_slices = max(1, min(int(num_slices), blocks))
    steps = pl.cdiv(blocks, num_slices)
    last_block = blocks - 1

    def in_map(i, j):
        # Clamp so we never request an out-of-range block; the kernel masks the
        # re-read rows out via the unclamped index.
        return (jnp.minimum(i * steps + j, last_block), 0)

    kernel = functools.partial(_obs_cost_kernel, rows=rows,
                               tile_rows=tile_rows, steps_per_slice=steps)

    sums, cnts = pl.pallas_call(
        kernel,
        out_shape=(
            jax.ShapeDtypeStruct((num_slices * 8, lanes), jnp.float32),
            jax.ShapeDtypeStruct((num_slices * 8, lanes), jnp.float32),
        ),
        grid_spec=pltpu.PrefetchScalarGridSpec(
            num_scalar_prefetch=0,
            grid=(num_slices, steps),
            in_specs=[
                pl.BlockSpec((tile_rows, lanes), in_map),
                pl.BlockSpec((tile_rows, lanes), in_map),
            ],
            out_specs=[
                pl.BlockSpec((8, lanes), lambda i, j: (i, 0)),
                pl.BlockSpec((8, lanes), lambda i, j: (i, 0)),
            ],
        ),
        compiler_params=pltpu.CompilerParams(
            dimension_semantics=("parallel", "arbitrary")),
    )(s2, x2)

    # Final tiny reduction + mean + weight in the wrapper (NaN if no finite
    # elements, matching F.mse_loss on an empty selection).
    return (w * jnp.sum(sums) / jnp.sum(cnts)).astype(jnp.float32)


def _reference(state, inp, w=1.0):
    mask = jnp.isfinite(inp)
    x = jnp.nan_to_num(inp)
    diff = jnp.where(mask, state - x, 0.0)
    return w * jnp.sum(diff * diff) / jnp.sum(mask.astype(jnp.float32))


if __name__ == "__main__":
    key = jax.random.PRNGKey(0)
    k1, k2, k3 = jax.random.split(key, 3)

    B, C, H, W = 2, 4, 16, 16          # NCHW, like the PyTorch module
    state = jax.random.normal(k1, (B, C, H, W), dtype=jnp.float32)
    obs = jax.random.normal(k2, (B, C, H, W), dtype=jnp.float32)

    # sprinkle some non-finite observations (missing data)
    nan_mask = jax.random.bernoulli(k3, p=0.2, shape=obs.shape)
    obs = jnp.where(nan_mask, jnp.nan, obs)
    obs = obs.at[0, 0, 0, 0].set(jnp.inf)

    w = 1.0
    loss = base_obs_cost(state, obs, w=w)
    loss = jax.block_until_ready(loss)

    ref = _reference(state, obs, w=w)
    assert jnp.allclose(loss, ref, rtol=1e-5, atol=1e-6), (loss, ref)

    print("KERNEL_OK")
</pallas_src>

<mosaic_0001>
module attributes {stable_mosaic.version = 11 : i64} {
  func.func @_obs_cost_kernel(%arg0: i32, %arg1: i32, %arg2: memref<16x128xf32, #tpu.memory_space<vmem>>, %arg3: memref<16x128xf32, #tpu.memory_space<vmem>>, %arg4: memref<8x128xf32, #tpu.memory_space<vmem>>, %arg5: memref<8x128xf32, #tpu.memory_space<vmem>>) attributes {dimension_semantics = [#tpu.dimension_semantics<parallel>, #tpu.dimension_semantics<arbitrary>], iteration_bounds = array<i64: 1, 1>, scalar_prefetch = 0 : i64, scratch_operands = 0 : i64, tpu.core_type = #tpu.core_type<tc>, window_params = [{transform_indices = @transform_0, window_bounds = array<i64: 16, 128>}, {transform_indices = @transform_1, window_bounds = array<i64: 16, 128>}, {transform_indices = @transform_2, window_bounds = array<i64: 8, 128>}, {transform_indices = @transform_3, window_bounds = array<i64: 8, 128>}]} {
    %c0_i32 = arith.constant 0 : i32
    %0 = arith.cmpi eq, %arg1, %c0_i32 : i32
    %1 = arith.extui %0 : i1 to i32
    %c0_i32_0 = arith.constant 0 : i32
    %2 = arith.cmpi ne, %1, %c0_i32_0 : i32
    scf.if %2 {
      %cst_16 = arith.constant 0.000000e+00 : f32
      %32 = vector.broadcast %cst_16 : f32 to vector<8x128xf32>
      %c0_17 = arith.constant 0 : index
      %c0_18 = arith.constant 0 : index
      %33 = vector.load %arg4[%c0_17, %c0_18] : memref<8x128xf32, #tpu.memory_space<vmem>>, vector<8x128xf32>
      tpu.vector_store %arg4[%c0_17, %c0_18], %32 {strides = array<i32>} : memref<8x128xf32, #tpu.memory_space<vmem>>, vector<8x128xf32>,
      %cst_19 = arith.constant 0.000000e+00 : f32
      %34 = vector.broadcast %cst_19 : f32 to vector<8x128xf32>
      %c0_20 = arith.constant 0 : index
      %c0_21 = arith.constant 0 : index
      %35 = vector.load %arg5[%c0_20, %c0_21] : memref<8x128xf32, #tpu.memory_space<vmem>>, vector<8x128xf32>
      tpu.vector_store %arg5[%c0_20, %c0_21], %34 {strides = array<i32>} : memref<8x128xf32, #tpu.memory_space<vmem>>, vector<8x128xf32>,
    } else {
    }
    %c0 = arith.constant 0 : index
    %c0_1 = arith.constant 0 : index
    %3 = vector.load %arg2[%c0, %c0_1] : memref<16x128xf32, #tpu.memory_space<vmem>>, vector<16x128xf32>
    %c0_2 = arith.constant 0 : index
    %c0_3 = arith.constant 0 : index
    %4 = vector.load %arg3[%c0_2, %c0_3] : memref<16x128xf32, #tpu.memory_space<vmem>>, vector<16x128xf32>
    %c1_i32 = arith.constant 1 : i32
    %5 = arith.muli %arg0, %c1_i32 : i32
    %6 = arith.addi %5, %arg1 : i32
    %c16_i32 = arith.constant 16 : i32
    %7 = arith.muli %6, %c16_i32 : i32
    %8 = tpu.iota {dimensions = array<i32: 0>} : vector<16x128xi32>
    %9 = vector.broadcast %7 : i32 to vector<16x128xi32>
    %10 = arith.addi %9, %8 : vector<16x128xi32>
    %c16_i32_4 = arith.constant 16 : i32
    %11 = vector.broadcast %c16_i32_4 : i32 to vector<16x128xi32>
    %12 = arith.cmpi slt, %10, %11 : vector<16x128xi32>
    %13 = tpu.weird %4 : vector<16x128xf32> -> vector<16x128xi1>
    %cst = arith.constant dense<true> : vector<16x128xi1>
    %14 = arith.xori %13, %cst : vector<16x128xi1>
    %15 = arith.andi %14, %12 : vector<16x128xi1>
    %16 = arith.subf %3, %4 : vector<16x128xf32>
    %cst_5 = arith.constant 0.000000e+00 : f32
    %17 = vector.broadcast %cst_5 : f32 to vector<16x128xf32>
    %18 = arith.select %15, %16, %17 : vector<16x128xi1>, vector<16x128xf32>
    %19 = arith.mulf %18, %18 : vector<16x128xf32>
    %20 = arith.extui %15 : vector<16x128xi1> to vector<16x128xi32>
    %21 = arith.sitofp %20 : vector<16x128xi32> to vector<16x128xf32>
    %c0_6 = arith.constant 0 : index
    %c0_7 = arith.constant 0 : index
    %22 = vector.load %arg4[%c0_6, %c0_7] : memref<8x128xf32, #tpu.memory_space<vmem>>, vector<8x128xf32>
    %23 = vector.shape_cast %19 : vector<16x128xf32> to vector<2x8x128xf32>
    %cst_8 = arith.constant dense<0.000000e+00> : vector<8x128xf32>
    %24 = vector.multi_reduction <add>, %23, %cst_8 [0] : vector<2x8x128xf32> to vector<8x128xf32>
    %25 = arith.addf %22, %24 : vector<8x128xf32>
    %c0_9 = arith.constant 0 : index
    %c0_10 = arith.constant 0 : index
    %26 = vector.load %arg4[%c0_9, %c0_10] : memref<8x128xf32, #tpu.memory_space<vmem>>, vector<8x128xf32>
    tpu.vector_store %arg4[%c0_9, %c0_10], %25 {strides = array<i32>} : memref<8x128xf32, #tpu.memory_space<vmem>>, vector<8x128xf32>,
    %c0_11 = arith.constant 0 : index
    %c0_12 = arith.constant 0 : index
    %27 = vector.load %arg5[%c0_11, %c0_12] : memref<8x128xf32, #tpu.memory_space<vmem>>, vector<8x128xf32>
    %28 = vector.shape_cast %21 : vector<16x128xf32> to vector<2x8x128xf32>
    %cst_13 = arith.constant dense<0.000000e+00> : vector<8x128xf32>
    %29 = vector.multi_reduction <add>, %28, %cst_13 [0] : vector<2x8x128xf32> to vector<8x128xf32>
    %30 = arith.addf %27, %29 : vector<8x128xf32>
    %c0_14 = arith.constant 0 : index
    %c0_15 = arith.constant 0 : index
    %31 = vector.load %arg5[%c0_14, %c0_15] : memref<8x128xf32, #tpu.memory_space<vmem>>, vector<8x128xf32>
    tpu.vector_store %arg5[%c0_14, %c0_15], %30 {strides = array<i32>} : memref<8x128xf32, #tpu.memory_space<vmem>>, vector<8x128xf32>,
    return
  }
  func.func @transform_0(%arg0: i32, %arg1: i32) -> (i32, i32) {
    %c1_i32 = arith.constant 1 : i32
    %0 = arith.muli %arg0, %c1_i32 : i32
    %1 = arith.addi %0, %arg1 : i32
    %c0_i32 = arith.constant 0 : i32
    %2 = arith.minsi %1, %c0_i32 : i32
    %c0_i32_0 = arith.constant 0 : i32
    %c0_i32_1 = arith.constant 0 : i32
    return %2, %c0_i32_0 : i32, i32
  }
  func.func @transform_1(%arg0: i32, %arg1: i32) -> (i32, i32) {
    %c1_i32 = arith.constant 1 : i32
    %0 = arith.muli %arg0, %c1_i32 : i32
    %1 = arith.addi %0, %arg1 : i32
    %c0_i32 = arith.constant 0 : i32
    %2 = arith.minsi %1, %c0_i32 : i32
    %c0_i32_0 = arith.constant 0 : i32
    %c0_i32_1 = arith.constant 0 : i32
    return %2, %c0_i32_0 : i32, i32
  }
  func.func @transform_2(%arg0: i32, %arg1: i32) -> (i32, i32) {
    %c0_i32 = arith.constant 0 : i32
    %c0_i32_0 = arith.constant 0 : i32
    return %arg0, %c0_i32 : i32, i32
  }
  func.func @transform_3(%arg0: i32, %arg1: i32) -> (i32, i32) {
    %c0_i32 = arith.constant 0 : i32
    %c0_i32_0 = arith.constant 0 : i32
    return %arg0, %c0_i32 : i32, i32
  }
}

</mosaic_0001>

<bundles_post_ra>
// kernel: tpu_custom_call.1
= control target key start
LH: loop header
LB: loop body
LE: loop exit
PB: predicated region body
PF: predicated region fallthrough
CT: control target
= control target key end

     0   :  { %9 = vsyncpa [#allocation3], 0  ;;  %s279_s0 = inlined_call_operand.hbm [shape: f32[16,128], index: 0, kind: input, shape index: {}]   ;;  %s280_s1 = inlined_call_operand.hbm [shape: f32[16,128], index: 1, kind: input, shape index: {}]   ;;  %s281_s2 = inlined_call_operand.hbm [shape: f32[8,128], index: 2, kind: output, shape index: {0}]   ;;  %s282_s3 = inlined_call_operand.hbm [shape: f32[8,128], index: 3, kind: output, shape index: {1}]  }
   0x1   :  { %10 = vsyncpa [#allocation6], 0 }
   0x2   :  { %11 = vsyncpa [#allocation4], 0 }
   0x3   :  { %12 = vsyncpa [#allocation9], 0  ;;  %s239_s12 = smov [#allocation2]  }
   0x4   :  { %s24_s13 = sshll.u32 %s239_s12, 4  ;;  %s25_s13 = int_to_ptr.vmem [resolvable:$true] %s24_s13 }
   0x5   :  { %s159_s14 = scalar_lea.vmem %s25_s13, 256  ;;  %p164_p1 = scmp.lt.s32.totalorder %s25_s13, %s25_s13 }
   0x6   :  { %p160_p0 = scmp.ne.s32.totalorder %s25_s13, %s159_s14  ;;  %p165_p2 = scmp.lt.s32.totalorder %s159_s14, %s159_s14 }
   0x8   :  { %p166_p3 = por %p165_p2, %p164_p1 }
   0xa   :  { %p167_p4 = pnand %p166_p3, %p160_p0 }
   0xc   :  { %170 = shalt.err (!%p167_p4)
}
   0xd   :  { %s240_s15 = smov 128   ;;  %s241_s16 = smov 8  }
   0xe   :  { %30 = dma.hbm_to_vmem [thread:$0]  %s279_s0, 256, %s25_s13, [#allocation3], %s240_s15, %s240_s15, %s241_s16  }
   0xf   :  { %s242_s19 = smov [#allocation5]  }
  0x10   :  { %s42_s20 = sshll.u32 %s242_s19, 4  ;;  %s43_s20 = int_to_ptr.vmem [resolvable:$true] %s42_s20 }
  0x11   :  { %s179_s21 = scalar_lea.vmem %s43_s20, 256  ;;  %p184_p6 = scmp.lt.s32.totalorder %s43_s20, %s43_s20 }
  0x12   :  { %p180_p5 = scmp.ne.s32.totalorder %s43_s20, %s179_s21  ;;  %p185_p7 = scmp.lt.s32.totalorder %s179_s21, %s179_s21 }
  0x14   :  { %p186_p8 = por %p185_p7, %p184_p6 }
  0x16   :  { %p187_p9 = pnand %p186_p8, %p180_p5 }
  0x18   :  { %190 = shalt.err (!%p187_p9)
}
  0x19   :  { %48 = dma.hbm_to_vmem [thread:$0]  %s280_s1, 256, %s43_s20, [#allocation6], %s240_s15, %s240_s15, %s241_s16  }
  0x1a   :  { %231 = dma.done.wait [#allocation3], 256  }
  0x1b   :  { %232 = vsyncadd [#allocation3], 4294967040 }
  0x1c   :  { %233 = dma.done.wait [#allocation6], 256  }
  0x1d   :  { %234 = vsyncadd [#allocation6], 4294967040  ;;  %v69_v0 = vld [vmem:[#allocation2] sm:$0xff]  ;;  %v70_v1 = vld [vmem:[#allocation2 + $0x8] sm:$0xff]  ;;  %vm243_vm2 = vmmov 1   ;;  %v244_v7 = vmov 0.0  }
  0x1e   :  { %v71_v2 = vld [vmem:[#allocation5] sm:$0xff]  ;;  %v72_v3 = vld [vmem:[#allocation5 + $0x8] sm:$0xff]  ;;  %s245_s0 = smov [#allocation8]   ;;  %s246_s24 = smov [#allocation7]  }
  0x1f   :  { %vm83_vm0 = vweird.f32 %v71_v2  ;;  %v89_v4 = vsub.f32 %v69_v0, %v71_v2  ;;  %vm84_vm1 = vweird.f32 %v72_v3  ;;  %v90_v5 = vsub.f32 %v70_v1, %v72_v3  ;;  %s123_s1 = sshll.u32 %s245_s0, 4  ;;  %s113_s25 = sshll.u32 %s246_s24, 4  ;;  %s124_s1 = int_to_ptr.vmem [resolvable:$true] %s123_s1  ;;  %s114_s25 = int_to_ptr.vmem [resolvable:$true] %s113_s25 }
  0x20   :  { %vm85_vm3 = vmxor %vm83_vm0, %vm243_vm2  ;;  %s191_s26 = scalar_lea.vmem %s124_s1, 128  ;;  %p196_p11 = scmp.lt.s32.totalorder %s124_s1, %s124_s1 }
  0x21   :  { %vm86_vm4 = vmxor %vm84_vm1, %vm243_vm2  ;;  %v91_v6 = vsel %vm85_vm3, %v89_v4, 0.0  ;;  %v141_v8 = vsel %vm85_vm3, 1.0, %v244_v7  ;;  %p192_p10 = scmp.ne.s32.totalorder %s124_s1, %s191_s26  ;;  %p197_p12 = scmp.lt.s32.totalorder %s191_s26, %s191_s26 }
  0x22   :  { %v92_v9 = vsel %vm86_vm4, %v90_v5, 0.0  ;;  %v93_v10 = vmul.f32 %v91_v6, %v91_v6  ;;  %v142_v11 = vsel %vm86_vm4, 1.0, %v244_v7 }
  0x23   :  { %v94_v12 = vmul.f32 %v92_v9, %v92_v9  ;;  %v104_v13 = vadd.f32 %v142_v11, %v141_v8  ;;  %p198_p13 = por %p197_p12, %p196_p11 }
  0x25   :  { %v100_v14 = vadd.f32 %v94_v12, %v93_v10  ;;  %106 = vst [vmem:[#allocation8] sm:$0xff] %v104_v13  ;;  %p199_p0 = pnand %p198_p13, %p192_p10 }
  0x27   :  { %202 = shalt.err (!%p199_p0)
}
  0x28   :  { %126 = dma.vmem_to_hbm [thread:$0]  %s124_s1, 128, %s282_s3, [#allocation9]   ;;  %102 = vst [vmem:[#allocation7] sm:$0xff] %v100_v14 }
  0x29   :  { %s211_s29 = scalar_lea.vmem %s114_s25, 128  ;;  %p216_p2 = scmp.lt.s32.totalorder %s114_s25, %s114_s25 }
  0x2a   :  { %p212_p1 = scmp.ne.s32.totalorder %s114_s25, %s211_s29  ;;  %p217_p3 = scmp.lt.s32.totalorder %s211_s29, %s211_s29 }
  0x2c   :  { %p218_p4 = por %p217_p3, %p216_p2 }
  0x2e   :  { %p219_p5 = pnand %p218_p4, %p212_p1 }
  0x30   :  { %222 = shalt.err (!%p219_p5)
}
  0x31   :  { %116 = dma.vmem_to_hbm [thread:$0]  %s114_s25, 128, %s281_s2, [#allocation4]  }
  0x32   :  { %235 = dma.done.wait [#allocation4], 128  }
  0x33   :  { %236 = vsyncadd [#allocation4], 4294967168 }
  0x34   :  { %237 = dma.done.wait [#allocation9], 128  }
  0x35   :  { %238 = vsyncadd [#allocation9], 4294967168 }
  0x36   :  { %133 = vsyncpa [#allocation3], 1 }
  0x37   :  { %134 = vsyncpa [#allocation6], 1 }
  0x38   :  { %135 = vsyncpa [#allocation4], 1 }
  0x39   :  { %136 = vsyncpa [#allocation9], 1 }

</bundles_post_ra>
